<compile_context>
chip_gen: v7x
topology: tpu7x:2x2x1
jax: 0.10.0
libtpu: 0.0.40
codegen_flags: <defaults>
</compile_context>

<pallas_src>
import functools

import jax
import jax.numpy as jnp
import numpy as np
from jax.experimental import pallas as pl
from jax.experimental.pallas import tpu as pltpu


def _split_linear_kernel(x_ref, w_ref, b_ref, o_ref, acc_ref):
    """One (tm, tn) output tile of one branch: accumulate over K tiles."""
    k = pl.program_id(3)

    @pl.when(k == 0)
    def _init():
        # Bias folded into the accumulator init: no separate full-width VPU
        # pass after the matmul.
        acc_ref[...] = jnp.broadcast_to(
            b_ref[...].astype(jnp.float32), acc_ref.shape)

    # If the weights were stored bf16 at prep time they are widened on the
    # VMEM tile here; accumulation is always f32.
    acc_ref[...] += jnp.dot(x_ref[...], w_ref[...],
                            preferred_element_type=jnp.float32)

    @pl.when(k == pl.num_programs(3) - 1)
    def _store():
        o_ref[...] = acc_ref[...].astype(o_ref.dtype)


def _pick_tile(dim, max_tile, align):
    """Largest legal tile <= max_tile: the full dim, or an `align`-multiple
    divisor of it (keeps every BlockSpec's trailing dims either full-extent or
    (8,128)-aligned)."""
    if dim <= max_tile:
        return dim
    t = (max_tile // align) * align
    while t >= align:
        if dim % t == 0:
            return t
        t -= align
    return dim  # fall back to whole-dim residency


def prepare_split_params(w_stack, b_stack, *, stack="v", weight_dtype=None):
    """Run ONCE at module init (never per forward call).

    w_stack: (n_branch, in_f, out_f)  per-branch Linear weight (pre-transposed)
    b_stack: (n_branch, out_f) or (n_branch, 1, out_f)

    'v' keeps the stacked per-branch layout (no transpose needed); 'h' fuses
    the branches column-wise so the kernel's fused N axis directly produces
    the hstack layout.  Optional bf16 weight cast happens here, once.  Bias
    stays f32 (it is folded into the f32 accumulator).
    """
    n_branch, in_f, out_f = w_stack.shape
    b_stack = jnp.reshape(b_stack, (n_branch, 1, out_f)).astype(jnp.float32)
    if stack == "v":
        w, b = w_stack, b_stack
    elif stack == "h":
        w = jnp.transpose(w_stack, (1, 0, 2)).reshape(in_f, n_branch * out_f)
        b = b_stack.reshape(1, n_branch * out_f)
    else:
        raise ValueError(f"stack must be 'v' or 'h', got {stack!r}")
    if weight_dtype is not None:
        w = w.astype(weight_dtype)
    return w, b


@functools.partial(jax.jit, static_argnames=("stack", "tm", "tn", "tk"))
def split_forward(x, w, b, *, stack="v", tm=None, tn=None, tk=None):
    """Forward of Split(Linear * n, stack=stack); params from prepare_split_params."""
    batch, in_f = x.shape
    out_dtype = x.dtype

    if stack == "v":
        n_branch, w_in, out_f = w.shape
        fused_n = out_f                    # N grid axis runs within one branch
        out_shape = jax.ShapeDtypeStruct((n_branch * batch, out_f), out_dtype)
    elif stack == "h":
        w_in, fused_n = w.shape            # N grid axis spans all branches
        n_branch = 1                       # branches live inside the fused N axis
        out_shape = jax.ShapeDtypeStruct((batch, fused_n), out_dtype)
    else:
        raise ValueError(f"stack must be 'v' or 'h', got {stack!r}")
    if w_in != in_f:
        raise ValueError("weight/in_features mismatch")

    # Tile sizes: full dims at small shapes (single lane-dense block per tile),
    # 128/8-aligned tiles at production shapes.  For 'v', batch should be a
    # multiple of 8 so the row-block mapping stays sublane aligned.
    tm = tm if tm is not None else _pick_tile(batch, 256, 8)
    tk = tk if tk is not None else _pick_tile(in_f, 512, 128)
    tn = tn if tn is not None else _pick_tile(fused_n, 512, 128)
    num_m, num_n, num_k = batch // tm, fused_n // tn, in_f // tk
    grid = (n_branch, num_m, num_n, num_k)          # K innermost (reduction)

    x_spec = pl.BlockSpec((tm, tk), lambda bi, m, n, k: (m, k))
    if stack == "v":
        # Branch selected purely via the index_map; branch dim squeezed away.
        w_spec = pl.BlockSpec((None, tk, tn), lambda bi, m, n, k: (bi, k, n))
        b_spec = pl.BlockSpec((None, 1, tn), lambda bi, m, n, k: (bi, 0, n))
        # vstack: branch bi's tiles land in row-block bi of the output.
        o_spec = pl.BlockSpec((tm, tn), lambda bi, m, n, k: (bi * num_m + m, n))
    else:
        w_spec = pl.BlockSpec((tk, tn), lambda bi, m, n, k: (k, n))
        b_spec = pl.BlockSpec((1, tn), lambda bi, m, n, k: (0, n))
        # hstack: the fused N axis already IS the concatenated layout.
        o_spec = pl.BlockSpec((tm, tn), lambda bi, m, n, k: (m, n))

    # VMEM budget: double-buffered inputs + output + f32 accumulator.  Only
    # pass an explicit limit when the tiles actually outgrow the default
    # scoped budget (keeps the tiny-shape path identical to defaults).
    per_step = (2 * (tm * tk + tk * tn + tn) + 3 * tm * tn) * 4
    vmem_limit = (int(min(6 * per_step, 64 * 1024 * 1024))
                  if 6 * per_step > 16 * 1024 * 1024 else None)

    return pl.pallas_call(
        _split_linear_kernel,
        out_shape=out_shape,
        grid_spec=pltpu.PrefetchScalarGridSpec(
            num_scalar_prefetch=0,
            grid=grid,
            in_specs=[x_spec, w_spec, b_spec],
            out_specs=o_spec,
            scratch_shapes=[pltpu.VMEM((tm, tn), jnp.float32)],
        ),
        compiler_params=pltpu.CompilerParams(
            dimension_semantics=("parallel", "parallel", "parallel", "arbitrary"),
            vmem_limit_bytes=vmem_limit,
        ),
    )(x, w, b)


def _reference(x, w_stack, b_stack, stack="v"):
    outs = [x @ w_stack[i] + b_stack[i].reshape(1, -1)
            for i in range(w_stack.shape[0])]
    return jnp.concatenate(outs, axis=0 if stack == "v" else 1)


if __name__ == "__main__":
    # Two Linear(32, 32) branches, batch 8 (cat_dim=0/1 on 2-D == 'v'/'h').
    batch, in_f, out_f, n_branch = 8, 32, 32, 2

    key = jax.random.PRNGKey(0)
    kx, kw, kb = jax.random.split(key, 3)
    x = jax.random.normal(kx, (batch, in_f), dtype=jnp.float32)
    w_stack = 0.05 * jax.random.normal(kw, (n_branch, in_f, out_f), dtype=jnp.float32)
    b_stack = 0.01 * jax.random.normal(kb, (n_branch, 1, out_f), dtype=jnp.float32)

    ref_v = _reference(x, w_stack, b_stack, stack="v")
    ref_h = _reference(x, w_stack, b_stack, stack="h")

    # --- stack='v' (torch.vstack), f32: exact parity ---
    wv, bv = prepare_split_params(w_stack, b_stack, stack="v")          # once, at init
    out_v = split_forward(x, wv, bv, stack="v")
    jax.block_until_ready(out_v)
    assert out_v.shape == (n_branch * batch, out_f)
    np.testing.assert_allclose(np.asarray(out_v), np.asarray(ref_v), rtol=1e-5, atol=1e-5)

    # --- stack='h' (torch.hstack), f32: exact parity ---
    wh, bh = prepare_split_params(w_stack, b_stack, stack="h")          # once, at init
    out_h = split_forward(x, wh, bh, stack="h")
    jax.block_until_ready(out_h)
    assert out_h.shape == (batch, n_branch * out_f)
    np.testing.assert_allclose(np.asarray(out_h), np.asarray(ref_h), rtol=1e-5, atol=1e-5)

    # --- bf16 *weights only* (cast once at prep; x stays f32; f32 accumulation) ---
    wv16, bv16 = prepare_split_params(w_stack, b_stack, stack="v", weight_dtype=jnp.bfloat16)
    out_v16 = split_forward(x, wv16, bv16, stack="v")
    jax.block_until_ready(out_v16)
    np.testing.assert_allclose(np.asarray(out_v16), np.asarray(ref_v), rtol=3e-2, atol=3e-2)

    wh16, bh16 = prepare_split_params(w_stack, b_stack, stack="h", weight_dtype=jnp.bfloat16)
    out_h16 = split_forward(x, wh16, bh16, stack="h")
    jax.block_until_ready(out_h16)
    np.testing.assert_allclose(np.asarray(out_h16), np.asarray(ref_h), rtol=3e-2, atol=3e-2)

    # TODO(synk): Split is generic over arbitrary sub-modules and cat_dim for
    # higher-rank tensors; only Linear branches on 2-D inputs are fused here.
    print("KERNEL_OK")
</pallas_src>

<mosaic_0001>
module attributes {stable_mosaic.version = 11 : i64} {
  func.func @_split_linear_kernel(%arg0: i32, %arg1: i32, %arg2: i32, %arg3: i32, %arg4: memref<8x32xf32, #tpu.memory_space<vmem>>, %arg5: memref<1x32x32xf32, #tpu.memory_space<vmem>>, %arg6: memref<1x1x32xf32, #tpu.memory_space<vmem>>, %arg7: memref<8x32xf32, #tpu.memory_space<vmem>>, %arg8: memref<8x32xf32, #tpu.memory_space<vmem>>) attributes {dimension_semantics = [#tpu.dimension_semantics<parallel>, #tpu.dimension_semantics<parallel>, #tpu.dimension_semantics<parallel>, #tpu.dimension_semantics<arbitrary>], iteration_bounds = array<i64: 2, 1, 1, 1>, scalar_prefetch = 0 : i64, scratch_operands = 1 : i64, tpu.core_type = #tpu.core_type<tc>, window_params = [{transform_indices = @transform_0, window_bounds = array<i64: 8, 32>}, {transform_indices = @transform_1, window_bounds = array<i64: 1, 32, 32>}, {transform_indices = @transform_2, window_bounds = array<i64: 1, 1, 32>}, {transform_indices = @transform_3, window_bounds = array<i64: 8, 32>}]} {
    %c0_i32 = arith.constant 0 : i32
    %0 = arith.cmpi eq, %arg3, %c0_i32 : i32
    %1 = arith.extui %0 : i1 to i32
    %c0_i32_0 = arith.constant 0 : i32
    %2 = arith.cmpi ne, %1, %c0_i32_0 : i32
    scf.if %2 {
      %c0_11 = arith.constant 0 : index
      %c0_12 = arith.constant 0 : index
      %c0_13 = arith.constant 0 : index
      %13 = vector.load %arg6[%c0_11, %c0_12, %c0_13] : memref<1x1x32xf32, #tpu.memory_space<vmem>>, vector<1x1x32xf32>
      %14 = vector.shape_cast %13 : vector<1x1x32xf32> to vector<1x32xf32>
      %15 = vector.shape_cast %14 : vector<1x32xf32> to vector<1x32xf32>
      %16 = vector.broadcast %15 : vector<1x32xf32> to vector<8x32xf32>
      %c0_14 = arith.constant 0 : index
      %c0_15 = arith.constant 0 : index
      %17 = vector.load %arg8[%c0_14, %c0_15] : memref<8x32xf32, #tpu.memory_space<vmem>>, vector<8x32xf32>
      tpu.vector_store %arg8[%c0_14, %c0_15], %16 {strides = array<i32>} : memref<8x32xf32, #tpu.memory_space<vmem>>, vector<8x32xf32>,
    } else {
    }
    %c0 = arith.constant 0 : index
    %c0_1 = arith.constant 0 : index
    %3 = vector.load %arg8[%c0, %c0_1] : memref<8x32xf32, #tpu.memory_space<vmem>>, vector<8x32xf32>
    %c0_2 = arith.constant 0 : index
    %c0_3 = arith.constant 0 : index
    %4 = vector.load %arg4[%c0_2, %c0_3] : memref<8x32xf32, #tpu.memory_space<vmem>>, vector<8x32xf32>
    %c0_4 = arith.constant 0 : index
    %c0_5 = arith.constant 0 : index
    %c0_6 = arith.constant 0 : index
    %5 = vector.load %arg5[%c0_4, %c0_5, %c0_6] : memref<1x32x32xf32, #tpu.memory_space<vmem>>, vector<1x32x32xf32>
    %6 = vector.shape_cast %5 : vector<1x32x32xf32> to vector<32x32xf32>
    %cst = arith.constant dense<0.000000e+00> : vector<8x32xf32>
    %7 = tpu.matmul %4, %6, %cst {dimension_numbers = #tpu.dot_dimension_numbers<[1], [0], [0], [1], [0, 0, 1, 1], [], []>} : vector<8x32xf32>, vector<32x32xf32>, vector<8x32xf32> -> vector<8x32xf32>
    %8 = arith.addf %3, %7 : vector<8x32xf32>
    %c0_7 = arith.constant 0 : index
    %c0_8 = arith.constant 0 : index
    %9 = vector.load %arg8[%c0_7, %c0_8] : memref<8x32xf32, #tpu.memory_space<vmem>>, vector<8x32xf32>
    tpu.vector_store %arg8[%c0_7, %c0_8], %8 {strides = array<i32>} : memref<8x32xf32, #tpu.memory_space<vmem>>, vector<8x32xf32>,
    %c0_i32_9 = arith.constant 0 : i32
    %10 = arith.cmpi eq, %arg3, %c0_i32_9 : i32
    %11 = arith.extui %10 : i1 to i32
    %c0_i32_10 = arith.constant 0 : i32
    %12 = arith.cmpi ne, %11, %c0_i32_10 : i32
    scf.if %12 {
      %c0_11 = arith.constant 0 : index
      %c0_12 = arith.constant 0 : index
      %13 = vector.load %arg8[%c0_11, %c0_12] : memref<8x32xf32, #tpu.memory_space<vmem>>, vector<8x32xf32>
      %c0_13 = arith.constant 0 : index
      %c0_14 = arith.constant 0 : index
      %14 = vector.load %arg7[%c0_13, %c0_14] : memref<8x32xf32, #tpu.memory_space<vmem>>, vector<8x32xf32>
      tpu.vector_store %arg7[%c0_13, %c0_14], %13 {strides = array<i32>} : memref<8x32xf32, #tpu.memory_space<vmem>>, vector<8x32xf32>,
    } else {
    }
    return
  }
  func.func @transform_0(%arg0: i32, %arg1: i32, %arg2: i32, %arg3: i32) -> (i32, i32) {
    %c0_i32 = arith.constant 0 : i32
    return %arg1, %arg3 : i32, i32
  }
  func.func @transform_1(%arg0: i32, %arg1: i32, %arg2: i32, %arg3: i32) -> (i32, i32, i32) {
    %c0_i32 = arith.constant 0 : i32
    return %arg0, %arg3, %arg2 : i32, i32, i32
  }
  func.func @transform_2(%arg0: i32, %arg1: i32, %arg2: i32, %arg3: i32) -> (i32, i32, i32) {
    %c0_i32 = arith.constant 0 : i32
    %c0_i32_0 = arith.constant 0 : i32
    return %arg0, %c0_i32, %arg2 : i32, i32, i32
  }
  func.func @transform_3(%arg0: i32, %arg1: i32, %arg2: i32, %arg3: i32) -> (i32, i32) {
    %c1_i32 = arith.constant 1 : i32
    %0 = arith.muli %arg0, %c1_i32 : i32
    %1 = arith.addi %0, %arg1 : i32
    %c0_i32 = arith.constant 0 : i32
    return %1, %arg2 : i32, i32
  }
}

</mosaic_0001>

<bundles_post_ra>
// kernel: split_forward.1
= control target key start
LH: loop header
LB: loop body
LE: loop exit
PB: predicated region body
PF: predicated region fallthrough
CT: control target
= control target key end

     0   :  { %8 = vsyncpa [#allocation4], 0  ;;  %s1031_s0 = inlined_call_operand.hbm [shape: f32[8,32], index: 0, kind: input, shape index: {}]   ;;  %s1032_s1 = inlined_call_operand.hbm [shape: f32[2,32,32], index: 1, kind: input, shape index: {}]   ;;  %s1033_s2 = inlined_call_operand.vmem [shape: f32[2,1,32], index: 2, kind: input, shape index: {}]   ;;  %s1034_s3 = inlined_call_operand.hbm [shape: f32[16,32], index: 3, kind: output, shape index: {}]  }
   0x1   :  { %9 = vsyncpa [#allocation7], 0 }
   0x2   :  { %11 = vsyncpa [#allocation7 + $0x1], 0 }
   0x3   :  { %12 = vsyncpa [#allocation5], 0 }
   0x4   :  { %14 = vsyncpa [#allocation5 + $0x1], 0  ;;  %s802_s12 = smov 0   ;;  %s804_s13 = smov 0  }
   0x5   :  { %s806_s14 = smov 0   ;;  %s808_s15 = smov 0  }
   0x6   :  { %s810_s16 = smov 0   ;;  %s812_s17 = smov 0  }
   0x7 LB: > { %s509_s18 = sadd.s32 4294967295, %s772_s17   ;;  %s510_s19 = sadd.s32 4294967294, %s772_s17   ;;  %s772_s17 = sphi %s812_s17, %s20_s17   ;;  %s768_s16 = sphi %s810_s16, %s1062_s16   ;;  %s764_s15 = sphi %s808_s15, %s1061_s15   ;;  %s760_s14 = sphi %s806_s14, %s1060_s14   ;;  %s756_s13 = sphi %s804_s13, %s1059_s13   ;;  %s752_s12 = sphi %s802_s12, %s1058_s12  }
   0x8   : > { %s85_s20 = sadd.s32 1, %s760_s14  ;;  %p92_p0 = scmp.ne.s32.totalorder %s760_s14, %s756_s13 }
   0x9   : > { %p93_p1 = scmp.eq.s32.totalorder %s772_s17, 0  ;;  %p98_p2 = scmp.ne.s32.totalorder %s756_s13, %s752_s12 }
   0xa   : > { %p840_p3 = scmp.eq.s32.totalorder %s509_s18, 0  ;;  %p154_p4 = scmp.eq.s32.totalorder %s509_s18, 1 }
   0xb   : > { %p844_p5 = por %p93_p1, %p92_p0  ;;  %p160_p6 = scmp.eq.s32.totalorder %s510_s19, 1 }
   0xc   : > { %s1041_s21 = scalar_select %p840_p3, 1, 0 }
   0xd   : > { %p850_p7 = por %p840_p3, %p98_p2  ;;  %p854_p8 = por %p154_p4, %p92_p0 }
   0xe   : > { %p858_p9 = por %p160_p6, %p98_p2  ;;  %p511_p10 = scmp.ge.s32.totalorder %s772_s17, 1 }
   0xf   : > { %s1043_s23 = scalar_select %p850_p7, 1, 0 }
  0x10   : > { %s1044_s24 = scalar_select %p854_p8, 1, 0 }
  0x11   : > { %s1045_s25 = scalar_select %p858_p9, 1, 0 }
  0x12   : > { %p167_p11 = scmp.lt.s32.totalorder %s772_s17, 3  ;;  %s774_s27 = smov [#allocation3]  }
  0x13   : > { %s183_s28 = sshll.u32 %s774_s27, 4  ;;  %p571_p1 = scmp.lt.s32.totalorder %s772_s17, 2  ;;  %s184_s28 = int_to_ptr.vmem [resolvable:$true] %s183_s28 }
  0x14   : > { %p865_p13 = pnand %p511_p10, %p167_p11  ;;  %s46_s4 = sadd.s32 1, %s768_s16 }
  0x15   : > { %p874_p4 = pnand %p571_p1, %p844_p5  ;;  %p885_p6 = scmp.ge.s32.totalorder %s46_s4, 2 }
  0x16   : > { %s1046_s26 = scalar_select %p865_p13, 1, 0 }
  0x17   : > { %p558_p0 = pneg %p865_p13  ;;  %s194_s6 = sand.u32 1, %s760_s14  }
  0x18   : > { %s1047_s29 = scalar_select %p874_p4, 1, 0 }
  0x19   : > { %p880_p2 = pnand %p558_p0, %p840_p3  ;;  %s628_s9 = scalar_lea.hbm %s1031_s0, 128 }
  0x1a   : > { %s1049_s5 = scalar_select %p885_p6, 1, 0 }
  0x1b   : > { %p629_p5 = scmp.ne.s32.totalorder %s1031_s0, %s628_s9  ;;  %p630_p10 = pneg %p880_p2 }
  0x1c   : > { %p635_p0 = scmp.lt.u32.totalorder %s628_s9, %s1031_s0 }
  0x1d   : > { %p631_p11 = pnand %p630_p10, %p629_p5 }
  0x1f   : > { %p632_p1 = pneg %p631_p11 }
  0x21   : > { %p637_p12 = pnand %p635_p0, %p632_p1 }
  0x23   : > { %640 = shalt.err (!%p637_p12)
}
  0x24   : > { %s641_s22 = scalar_lea.vmem %s184_s28, 128  ;;  %p649_p3 = scmp.lt.s32.totalorder %s184_s28, %s184_s28 }
  0x25   : > { %p642_p9 = scmp.ne.s32.totalorder %s184_s28, %s641_s22  ;;  %p650_p13 = scmp.lt.s32.totalorder %s641_s22, %s641_s22 }
  0x27   : > { %p644_p8 = pnand %p642_p9, %p630_p10  ;;  %p651_p4 = por %p650_p13, %p649_p3 }
  0x29   : > { %p645_p7 = pneg %p644_p8 }
  0x2b   : > { %p652_p6 = pnand %p651_p4, %p645_p7 }
  0x2d   : > { %655 = shalt.err (!%p652_p6)
}
  0x2e   : > { %561 = dma.hbm_to_vmem [thread:$0]  (!%p880_p2), %s1031_s0, 128, %s184_s28, [#allocation4]  }
  0x2f   : > { %p1050_p9 = scmp.ne.s32.totalorder %s1049_s5, 0  ;;  %s514_s8 = sshll.u32 %s194_s6, 5 }
  0x30   : > { %s527_s10 = sshll.u32 %s768_s16, 9  ;;  %s198_s19 = scalar_lea.vmem [#allocation6], %s514_s8 }
  0x31   : > { %s1064_s4 = smov (%p1050_p9, %s46_s4), 0  ;;  %s916_s18 = scalar_lea.hbm %s1032_s1, %s527_s10 }
  0x32   : > { %s78_s9 = ssub.s32 %s768_s16, %s1064_s4  ;;  %s208_s22 = sshll.u32 %s198_s19, 4  ;;  %s923_s22 = int_to_ptr.vmem [resolvable:$true] %s208_s22 }
  0x33   : > { %p83_p3 = scmp.eq.s32.totalorder %s78_s9, 0  ;;  %s925_s5 = scalar_lea.sflag [#allocation7], %s194_s6 }
  0x34   : > { %s656_s27 = scalar_lea.hbm %s916_s18, 512  ;;  %p1051_p8 = scmp.ne.s32.totalorder %s1047_s29, 0 }
  0x35   : > { %s921_s28 = scalar_select %p83_p3, %s760_s14, %s85_s20  }
  0x36   : > { %p657_p7 = scmp.ne.s32.totalorder %s916_s18, %s656_s27  ;;  %p658_p12 = pneg %p1051_p8 }
  0x37   : > { %s661_s8 = scalar_lea.hbm %s1032_s1, 1024  ;;  %p662_p2 = scmp.lt.u32.totalorder %s916_s18, %s1032_s1 }
  0x38   : > { %p659_p13 = pnand %p658_p12, %p657_p7  ;;  %p663_p6 = scmp.lt.u32.totalorder %s661_s8, %s656_s27 }
  0x39   : > { %p665_p10 = scmp.lt.u32.totalorder %s656_s27, %s916_s18 }
  0x3a   : > { %p660_p4 = pneg %p659_p13  ;;  %p664_p5 = por %p663_p6, %p662_p2 }
  0x3c   : > { %p666_p11 = por %p665_p10, %p664_p5 }
  0x3e   : > { %p667_p1 = pnand %p666_p11, %p660_p4 }
  0x40   : > { %670 = shalt.err (!%p667_p1)
}
  0x41   : > { %s671_s20 = scalar_lea.vmem %s923_s22, 512  ;;  %s775_s6 = smov [#allocation6]  }
  0x42   : > { %p672_p0 = scmp.ne.s32.totalorder %s923_s22, %s671_s20  ;;  %s676_s11 = sshll.u32 %s775_s6, 4  ;;  %s677_s11 = int_to_ptr.vmem [resolvable:$false] %s676_s11 }
  0x43   : > { %s678_s19 = scalar_lea.vmem %s677_s11, 1024  ;;  %p679_p7 = scmp.lt.s32.totalorder %s923_s22, %s677_s11 }
  0x44   : > { %p674_p9 = pnand %p672_p0, %p658_p12  ;;  %p680_p13 = scmp.lt.s32.totalorder %s678_s19, %s671_s20 }
  0x46   : > { %p675_p3 = pneg %p674_p9  ;;  %p681_p2 = por %p680_p13, %p679_p7 }
  0x48   : > { %p682_p6 = pnand %p681_p2, %p675_p3 }
  0x4a   : > { %685 = shalt.err (!%p682_p6)
}
  0x4b   : > { %s776_s27 = smov 128   ;;  %s777_s7 = smov 8  }
  0x4c   : > { %565 = dma.hbm_to_vmem [thread:$0]  (!%p1051_p8), %s916_s18, 512, %s923_s22, %s925_s5, %s776_s27, %s776_s27, %s777_s7  }
  0x4d   : > { %p1052_p12 = scmp.ne.s32.totalorder %s1046_s26, 0 }
  0x4e   : > { %p1053_p4 = scmp.ne.s32.totalorder (!%p1052_p12), %s1041_s21, 0 }
  0x4f   : > { %229 = sbr.rel (%p1052_p12) target bundleno = 338 (0x152), region = 32 }
  0x56   : > { %739 = dma.done.wait (%p1053_p4), [#allocation4], 128  }
  0x57   : > { %741 = vsyncadd (%p1053_p4), [#allocation4], 4294967168  ;;  %s960_s9 = sand.u32 1, %s756_s13   ;;  %p1054_p5 = scmp.ne.s32.totalorder %s1043_s23, 0 }
  0x58   : > { %s519_s8 = sshll.u32 %s960_s9, 5  ;;  %s236_s10 = scalar_lea.sflag [#allocation7], %s960_s9 }
  0x59   : > { %s239_s30 = scalar_lea.vmem [#allocation6], %s519_s8 }
  0x5a   : > { %743 = dma.done.wait (%p1054_p5), %s236_s10, 512  }
  0x5b   : > { %745 = vsyncadd (%p1054_p5), %s236_s10, 4294966784  ;;  %p269_p8 = scmp.lt.s32.totalorder %s764_s15, 1  ;;  %v778_v0 = vmov 0.0|0.0   ;;  %vm779_vm0 = vmmov 0   ;;  %v780_v1 = vmov 0.0   ;;  %v291_v2 = vld [vmem:[%s239_s30] sm:$0xff] }
  0x5c   : > { %544 = vmatprep.subr.bf16.mxu0 %v778_v0  ;;  %541 = vmatprep.mubr.msk.f32.mxu0 %vm779_vm0, %v780_v1  ;;  %v292_v3 = vld [vmem:[%s239_s30 + $0x8] sm:$0xff]  ;;  %v293_v4 = vld [vmem:[%s239_s30 + $0x10] sm:$0xff]  ;;  %v294_v6 = vld [vmem:[%s239_s30 + $0x18] sm:$0xff]  ;;  %vm287_vm1 = vcmask 261120   ;;  %s520_s23 = sshll.u32 %s960_s9, 3  ;;  %s524_s22 = sshll.u32 %s764_s15, 7 }
  0x5d   : > { %s270_s21 = scalar_select %p269_p8, %s764_s15, 1  ;;  %v545_v5 = vpack.c.bf16 %v292_v3, %v291_v2  ;;  %v548_v8 = vpack.c.bf16 %v294_v6, %v293_v4  ;;  %v290_v9 = vld [vmem:[#allocation3] sm:$0xff] }
  0x5e   : > { %s267_s5 = scalar_lea.vmem [#allocation8], %s520_s23  ;;  %s981_s19 = scalar_lea.hbm %s1034_s3, %s524_s22 }
  0x5f   : > { %s274_s18 = scalar_lea.vmem %s1033_s2, %s270_s21  ;;  %546 = vmatpush3.bf16.msra.mxu0 %v545_v5  ;;  %s392_s20 = sshll.u32 %s267_s5, 4  ;;  %s983_s20 = int_to_ptr.vmem [resolvable:$true] %s392_s20 }
  0x60   : > { %v521_v7 = vld [vmem:[%s274_s18] ss:$0 sm:$0xff]  ;;  %547 = vmatprep.subr.bf16.mxu0 %v778_v0  ;;  %s377_s27 = scalar_lea.sflag [#allocation5], %s960_s9  ;;  %s686_s7 = scalar_lea.vmem %s983_s20, 128 }
  0x61   : > { %288 = vst.msk [vmem:[#allocation2] sm:$0xff] %vm287_vm1, %v521_v7  ;;  %p687_p10 = scmp.ne.s32.totalorder %s983_s20, %s686_s7  ;;  %p1055_p11 = scmp.ne.s32.totalorder %s1044_s24, 0 }
  0x62   : > { %s781_s15 = smov [#allocation8]  }
  0x63   : > { %549 = vmatpush3.bf16.msra.mxu0 %v548_v8  ;;  %p688_p1 = pnand %p687_p10, %p1055_p11  ;;  %s690_s8 = sshll.u32 %s781_s15, 4  ;;  %s691_s8 = int_to_ptr.vmem [resolvable:$false] %s690_s8 }
  0x64   : > { %s692_s10 = scalar_lea.vmem %s691_s8, 256  ;;  %p693_p9 = scmp.lt.s32.totalorder %s983_s20, %s691_s8 }
  0x65   : > { %p689_p0 = pneg %p688_p1  ;;  %p694_p3 = scmp.lt.s32.totalorder %s692_s10, %s686_s7 }
  0x66   : > { %542 = vmatmul.mubr.msk.f32.vlgmr.msra.gmra.mrb[0].mxu0 %vm287_vm1, %v290_v9 }
  0x67   : > { %p695_p7 = por %p694_p3, %p693_p9 }
  0x68   : > { %v289_v10 = vld [vmem:[#allocation2] sm:$0xff] }
  0x69   : > { %p696_p13 = pnand %p695_p7, %p689_p0 }
 0x139   : > { %v365_v11 = vpop.f32.mrb[0].mxu0 }
 0x13a   : > { %v369_v12 = vadd.f32 %v365_v11, %v289_v10  ;;  %v543_v13 = vpop.f32.mrb[1].mxu0 }
 0x13c   : > { %370 = vst.msk [vmem:[#allocation2] sm:$0xff] %vm287_vm1, %v369_v12 }
 0x143   : > { %v374_v14 = vld [vmem:[#allocation2] sm:$0xff] }
 0x144   : > { %375 = vst.msk [vmem:[%s267_s5] sm:$0xff] %vm287_vm1, %v374_v14 }
 0x145   : > { %699 = shalt.err (!%p696_p13)
}
 0x146   : > { %s700_s9 = scalar_lea.hbm %s981_s19, 128  ;;  %s704_s26 = scalar_lea.hbm %s1034_s3, 256 }
 0x147   : > { %p701_p2 = scmp.ne.s32.totalorder %s981_s19, %s700_s9  ;;  %p705_p4 = scmp.lt.u32.totalorder %s981_s19, %s1034_s3 }
 0x148   : > { %p706_p5 = scmp.lt.u32.totalorder %s704_s26, %s700_s9  ;;  %p708_p10 = scmp.lt.u32.totalorder %s700_s9, %s981_s19 }
 0x149   : > { %p702_p6 = pnand %p701_p2, %p1055_p11 }
 0x14a   : > { %p707_p8 = por %p706_p5, %p705_p4 }
 0x14b   : > { %p703_p12 = pneg %p702_p6 }
 0x14c   : > { %p709_p1 = por %p708_p10, %p707_p8 }
 0x14e   : > { %p710_p0 = pnand %p709_p1, %p703_p12 }
 0x150   : > { %713 = shalt.err (!%p710_p0)
}
 0x151   : > { %556 = dma.vmem_to_hbm [thread:$0]  (%p1055_p11), %s983_s20, 128, %s981_s19, %s377_s27  }
 0x152 PF: > { %s404_s23 = sand.u32 1, %s752_s12   ;;  %p1056_p9 = scmp.ne.s32.totalorder %s1045_s25, 0 }
 0x153   : > { %p1057_p3 = scmp.ge.s32.totalorder %s772_s17, 2  ;;  %s405_s22 = scalar_lea.sflag [#allocation5], %s404_s23 }
 0x155   : > { %p567_p7 = pnand %p1057_p3, %p1056_p9 }
 0x157   : > { %747 = dma.done.wait (!%p567_p7), %s405_s22, 128  }
 0x158   : > { %749 = vsyncadd (!%p567_p7), %s405_s22, 4294967168  ;;  %s20_s17 = sadd.s32 1, %s772_s17   ;;  %s1058_s12 = smov %s756_s13 }
 0x159   : > { %p17_p13 = scmp.ge.s32.totalorder %s20_s17, 4   ;;  %s1059_s13 = smov %s760_s14 }
 0x15a   : > { %s1060_s14 = smov %s921_s28  ;;  %s1061_s15 = smov %s768_s16 }
 0x15b   : > { %s1062_s16 = smov %s1064_s4  ;;  %19 = sbr.rel (!%p17_p13) target bundleno = 7 (0x7), region = 94 }
 0x162   :  { %410 = vsyncpa [#allocation4], 1 }
 0x163   :  { %412 = vsyncpa [#allocation4 + $0x1], 1 }
 0x164   :  { %413 = vsyncpa [#allocation7], 1 }
 0x165   :  { %415 = vsyncpa [#allocation7 + $0x1], 1 }
 0x166   :  { %416 = vsyncpa [#allocation5], 1 }
 0x167   :  { %418 = vsyncpa [#allocation5 + $0x1], 1 }

</bundles_post_ra>
